<compile_context>
chip_gen: v7x
topology: tpu7x:2x2x1
jax: 0.10.0
libtpu: 0.0.40
codegen_flags: <defaults>
</compile_context>

<pallas_src>
import numpy as np
import jax
import jax.numpy as jnp
from jax.experimental import pallas as pl
from jax.experimental.pallas import tpu as pltpu

_C1 = 0.01 ** 2
_C2 = 0.03 ** 2


def _gauss_1d(window_size: int, sigma: float = 1.5) -> np.ndarray:
    """1-D Gaussian, identical to the PyTorch module's window init."""
    x = np.arange(window_size, dtype=np.float64)
    g = np.exp(-((x - window_size // 2) ** 2) / (2.0 * sigma ** 2))
    return (g / g.sum()).astype(np.float32)


def _band_matrix(n: int, g: np.ndarray, pad: int) -> np.ndarray:
    """(n, n) band matrix M with M[i, j] = g[j - i + pad].

    M @ X applies the zero-padded 1-D Gaussian along rows; X @ M applies it
    along columns (g is symmetric, so M == M.T)."""
    m = np.zeros((n, n), dtype=np.float32)
    for i in range(n):
        for j in range(max(0, i - pad), min(n, i + pad + 1)):
            m[i, j] = g[j - i + pad]
    return m


def _vmem_estimate(bch: int, w: int) -> int:
    """Per-grid-step f32 working set, accounting for lane padding to 128 and
    2x double-buffering of the two streamed input blocks (~21 live planes:
    inputs, products, 5-stack, conv outputs, epilogue temporaries) plus the
    band matrices."""
    w_pad = max(128, ((w + 127) // 128) * 128)
    return 21 * bch * w_pad * 4 + (bch * bch + w * w_pad) * 4


def _choose_block_planes(nc: int, h: int, w: int,
                         mxu_rows: int = 256,
                         budget: int = 12 << 20) -> int:
    """Planes packed per grid step: the largest divisor of nc such that
      * the block-diagonal vertical band stays within ~one MXU tile
        (bc*H <= mxu_rows), so its zero blocks cost nothing beyond the MXU's
        own tile padding (bc == 1 for large H -> plain band_h, no kron), and
      * the lane-padded, double-buffered f32 working set fits a conservative
        per-step VMEM budget (safe under v5e's 16 MiB default scoped VMEM).
    Always returns at least 1."""
    best = 1
    for bc in range(1, nc + 1):
        if nc % bc:
            continue
        if bc > 1 and bc * h > mxu_rows:
            continue
        if _vmem_estimate(bc * h, w) <= budget:
            best = bc
    return best
    # TODO(synk): halo-strip tile H (overlapping (Th + 2*pad, W) blocks) for
    # very large planes instead of growing the per-step block / VMEM limit.


def _ssim_kernel(a_ref, bw_ref, x1_ref, x2_ref, o_ref):
    bc, h, w = x1_ref.shape
    rows = bc * h

    i1 = x1_ref[...].reshape(rows, w)     # bc row-stacked (H, W) planes
    i2 = x2_ref[...].reshape(rows, w)
    A = a_ref[...]                         # (bc*H, bc*H) block-diag vertical band
    Bw = bw_ref[...]                       # (W, W) horizontal band

    # Product planes, computed once per block.
    i11 = i1 * i1
    i22 = i2 * i2
    i12 = i1 * i2

    # Horizontal (width) pass: one fused matmul over all 5 quantities.
    stacked = jnp.concatenate([i1, i2, i11, i22, i12], axis=0)      # (5*rows, W)
    hz = jnp.dot(stacked, Bw, preferred_element_type=jnp.float32)   # (5*rows, W)

    # Vertical (height) pass: 5 dots against the small banded A.  bc is capped
    # at the MXU fill point, so the block-diagonal structure wastes no MXU
    # work beyond native tile padding (bc == 1 -> plain band_h).
    def vpass(q):
        return jnp.dot(A, hz[q * rows:(q + 1) * rows, :],
                       preferred_element_type=jnp.float32)

    mu1, mu2 = vpass(0), vpass(1)
    s11, s22, s12 = vpass(2), vpass(3), vpass(4)

    mu1_sq = mu1 * mu1
    mu2_sq = mu2 * mu2
    mu1_mu2 = mu1 * mu2
    sigma1_sq = s11 - mu1_sq
    sigma2_sq = s22 - mu2_sq
    sigma12 = s12 - mu1_mu2

    ssim_map = ((2.0 * mu1_mu2 + _C1) * (2.0 * sigma12 + _C2)) / (
        (mu1_sq + mu2_sq + _C1) * (sigma1_sq + sigma2_sq + _C2))

    # Lane-wise partial sum for this block, written to this block's own output
    # row.  No carried accumulator -> the grid axis is safely "parallel".
    o_ref[...] = jnp.sum(ssim_map, axis=0, keepdims=True).reshape(1, 1, w)


def ssim_loss(img1: jax.Array, img2: jax.Array, window_size: int = 11) -> jax.Array:
    """1 - mean(SSIM map); matches SSIMLoss.forward for 3-channel NCHW input."""
    assert img1.shape == img2.shape
    N, C, H, W = img1.shape
    assert C == 3, "SSIMLoss fixes channel=3"
    pad = window_size // 2

    g = _gauss_1d(window_size)
    band_h = _band_matrix(H, g, pad)          # (H, H)
    band_w = _band_matrix(W, g, pad)          # (W, W)

    nc = N * C
    bc = _choose_block_planes(nc, H, W)       # planes per grid step (MXU-fill capped)
    nb = nc // bc
    bch = bc * H

    # Small block-diagonal vertical band (identity when bc == 1).
    a_band = np.kron(np.eye(bc, dtype=np.float32), band_h)   # (bc*H, bc*H)

    x1 = img1.astype(jnp.float32).reshape(nc, H, W)
    x2 = img2.astype(jnp.float32).reshape(nc, H, W)

    a_spec = pl.BlockSpec((bch, bch), lambda i: (0, 0))
    bw_spec = pl.BlockSpec((W, W), lambda i: (0, 0))
    x_spec = pl.BlockSpec((bc, H, W), lambda i: (i, 0, 0))
    o_spec = pl.BlockSpec((1, 1, W), lambda i: (i, 0, 0))     # per-block partial sums

    est = _vmem_estimate(bch, W)
    vmem_limit = None
    if est > (10 << 20):
        # Raise the scoped-VMEM limit only when needed; keep below the v7x
        # 64 MiB physical ceiling.
        vmem_limit = int(min(2 * est, 40 << 20))

    partial = pl.pallas_call(
        _ssim_kernel,
        out_shape=jax.ShapeDtypeStruct((nb, 1, W), jnp.float32),
        grid_spec=pltpu.PrefetchScalarGridSpec(
            num_scalar_prefetch=0,
            grid=(nb,),
            in_specs=[a_spec, bw_spec, x_spec, x_spec],
            out_specs=o_spec,
        ),
        compiler_params=pltpu.CompilerParams(
            dimension_semantics=("parallel",),
            vmem_limit_bytes=vmem_limit,
        ),
    )(jnp.asarray(a_band), jnp.asarray(band_w), x1, x2)

    return 1.0 - jnp.sum(partial) / float(N * C * H * W)


def _ssim_ref_numpy(i1, i2, window_size=11, sigma=1.5):
    """Independent float64 numpy reference (direct 121-tap zero-padded conv)."""
    i1 = np.asarray(i1, np.float64)
    i2 = np.asarray(i2, np.float64)
    N, C, H, W = i1.shape
    ws, pad = window_size, window_size // 2
    g = np.exp(-((np.arange(ws) - ws // 2) ** 2) / (2.0 * sigma ** 2))
    g = g / g.sum()
    win = np.outer(g, g)

    def conv(x):
        xp = np.pad(x, ((0, 0), (0, 0), (pad, pad), (pad, pad)))
        out = np.zeros_like(x)
        for dy in range(ws):
            for dx in range(ws):
                out += win[dy, dx] * xp[:, :, dy:dy + H, dx:dx + W]
        return out

    mu1, mu2 = conv(i1), conv(i2)
    s11 = conv(i1 * i1) - mu1 ** 2
    s22 = conv(i2 * i2) - mu2 ** 2
    s12 = conv(i1 * i2) - mu1 * mu2
    m = ((2 * mu1 * mu2 + _C1) * (2 * s12 + _C2)) / (
        (mu1 ** 2 + mu2 ** 2 + _C1) * (s11 + s22 + _C2)
    )
    return 1.0 - m.mean()


if __name__ == "__main__":
    key = jax.random.PRNGKey(0)
    k1, k2 = jax.random.split(key)
    # batch=2, channels=3 (fixed by the module), spatial=16
    img1 = jax.random.uniform(k1, (2, 3, 16, 16), dtype=jnp.float32)
    img2 = jax.random.uniform(k2, (2, 3, 16, 16), dtype=jnp.float32)

    loss = jax.jit(ssim_loss)(img1, img2)
    jax.block_until_ready(loss)
    assert loss.shape == () and loss.dtype == jnp.float32

    ref = _ssim_ref_numpy(np.asarray(img1), np.asarray(img2))
    assert abs(float(loss) - float(ref)) < 1e-3, (float(loss), float(ref))
    print("KERNEL_OK")
</pallas_src>

<mosaic_0001>
module attributes {stable_mosaic.version = 11 : i64} {
  func.func @_ssim_kernel(%arg0: i32, %arg1: memref<96x96xf32, #tpu.memory_space<vmem>>, %arg2: memref<16x16xf32, #tpu.memory_space<vmem>>, %arg3: memref<6x16x16xf32, #tpu.memory_space<vmem>>, %arg4: memref<6x16x16xf32, #tpu.memory_space<vmem>>, %arg5: memref<1x1x16xf32, #tpu.memory_space<vmem>>) attributes {dimension_semantics = [#tpu.dimension_semantics<parallel>], iteration_bounds = array<i64: 1>, scalar_prefetch = 0 : i64, scratch_operands = 0 : i64, tpu.core_type = #tpu.core_type<tc>, window_params = [{pipeline_mode = #tpu.pipeline_mode<synchronous>, transform_indices = @transform_0, window_bounds = array<i64: 96, 96>}, {pipeline_mode = #tpu.pipeline_mode<synchronous>, transform_indices = @transform_1, window_bounds = array<i64: 16, 16>}, {transform_indices = @transform_2, window_bounds = array<i64: 6, 16, 16>}, {transform_indices = @transform_3, window_bounds = array<i64: 6, 16, 16>}, {transform_indices = @transform_4, window_bounds = array<i64: 1, 1, 16>}]} {
    %c0 = arith.constant 0 : index
    %c0_0 = arith.constant 0 : index
    %c0_1 = arith.constant 0 : index
    %0 = vector.load %arg3[%c0, %c0_0, %c0_1] : memref<6x16x16xf32, #tpu.memory_space<vmem>>, vector<6x16x16xf32>
    %1 = vector.shape_cast %0 : vector<6x16x16xf32> to vector<96x16xf32>
    %c0_2 = arith.constant 0 : index
    %c0_3 = arith.constant 0 : index
    %c0_4 = arith.constant 0 : index
    %2 = vector.load %arg4[%c0_2, %c0_3, %c0_4] : memref<6x16x16xf32, #tpu.memory_space<vmem>>, vector<6x16x16xf32>
    %3 = vector.shape_cast %2 : vector<6x16x16xf32> to vector<96x16xf32>
    %c0_5 = arith.constant 0 : index
    %c0_6 = arith.constant 0 : index
    %4 = vector.load %arg1[%c0_5, %c0_6] : memref<96x96xf32, #tpu.memory_space<vmem>>, vector<96x96xf32>
    %c0_7 = arith.constant 0 : index
    %c0_8 = arith.constant 0 : index
    %5 = vector.load %arg2[%c0_7, %c0_8] : memref<16x16xf32, #tpu.memory_space<vmem>>, vector<16x16xf32>
    %6 = arith.mulf %1, %1 : vector<96x16xf32>
    %7 = arith.mulf %3, %3 : vector<96x16xf32>
    %8 = arith.mulf %1, %3 : vector<96x16xf32>
    %9 = tpu.concatenate %1, %3, %6, %7, %8 in 0 : vector<96x16xf32>, vector<96x16xf32>, vector<96x16xf32>, vector<96x16xf32>, vector<96x16xf32> -> vector<480x16xf32>
    %cst = arith.constant dense<0.000000e+00> : vector<480x16xf32>
    %10 = tpu.matmul %9, %5, %cst {dimension_numbers = #tpu.dot_dimension_numbers<[1], [0], [0], [1], [0, 0, 1, 1], [], []>} : vector<480x16xf32>, vector<16x16xf32>, vector<480x16xf32> -> vector<480x16xf32>
    %11 = vector.extract_strided_slice %10 {offsets = [0, 0], sizes = [96, 16], strides = [1, 1]} : vector<480x16xf32> to vector<96x16xf32>
    %cst_9 = arith.constant dense<0.000000e+00> : vector<96x16xf32>
    %12 = tpu.matmul %4, %11, %cst_9 {dimension_numbers = #tpu.dot_dimension_numbers<[1], [0], [0], [1], [0, 0, 1, 1], [], []>} : vector<96x96xf32>, vector<96x16xf32>, vector<96x16xf32> -> vector<96x16xf32>
    %13 = vector.extract_strided_slice %10 {offsets = [96, 0], sizes = [96, 16], strides = [1, 1]} : vector<480x16xf32> to vector<96x16xf32>
    %cst_10 = arith.constant dense<0.000000e+00> : vector<96x16xf32>
    %14 = tpu.matmul %4, %13, %cst_10 {dimension_numbers = #tpu.dot_dimension_numbers<[1], [0], [0], [1], [0, 0, 1, 1], [], []>} : vector<96x96xf32>, vector<96x16xf32>, vector<96x16xf32> -> vector<96x16xf32>
    %15 = vector.extract_strided_slice %10 {offsets = [192, 0], sizes = [96, 16], strides = [1, 1]} : vector<480x16xf32> to vector<96x16xf32>
    %cst_11 = arith.constant dense<0.000000e+00> : vector<96x16xf32>
    %16 = tpu.matmul %4, %15, %cst_11 {dimension_numbers = #tpu.dot_dimension_numbers<[1], [0], [0], [1], [0, 0, 1, 1], [], []>} : vector<96x96xf32>, vector<96x16xf32>, vector<96x16xf32> -> vector<96x16xf32>
    %17 = vector.extract_strided_slice %10 {offsets = [288, 0], sizes = [96, 16], strides = [1, 1]} : vector<480x16xf32> to vector<96x16xf32>
    %cst_12 = arith.constant dense<0.000000e+00> : vector<96x16xf32>
    %18 = tpu.matmul %4, %17, %cst_12 {dimension_numbers = #tpu.dot_dimension_numbers<[1], [0], [0], [1], [0, 0, 1, 1], [], []>} : vector<96x96xf32>, vector<96x16xf32>, vector<96x16xf32> -> vector<96x16xf32>
    %19 = vector.extract_strided_slice %10 {offsets = [384, 0], sizes = [96, 16], strides = [1, 1]} : vector<480x16xf32> to vector<96x16xf32>
    %cst_13 = arith.constant dense<0.000000e+00> : vector<96x16xf32>
    %20 = tpu.matmul %4, %19, %cst_13 {dimension_numbers = #tpu.dot_dimension_numbers<[1], [0], [0], [1], [0, 0, 1, 1], [], []>} : vector<96x96xf32>, vector<96x16xf32>, vector<96x16xf32> -> vector<96x16xf32>
    %21 = arith.mulf %12, %12 : vector<96x16xf32>
    %22 = arith.mulf %14, %14 : vector<96x16xf32>
    %23 = arith.mulf %12, %14 : vector<96x16xf32>
    %24 = arith.subf %16, %21 : vector<96x16xf32>
    %25 = arith.subf %18, %22 : vector<96x16xf32>
    %26 = arith.subf %20, %23 : vector<96x16xf32>
    %cst_14 = arith.constant 2.000000e+00 : f32
    %27 = vector.broadcast %cst_14 : f32 to vector<96x16xf32>
    %28 = arith.mulf %27, %23 : vector<96x16xf32>
    %cst_15 = arith.constant 9.99999974E-5 : f32
    %29 = vector.broadcast %cst_15 : f32 to vector<96x16xf32>
    %30 = arith.addf %28, %29 : vector<96x16xf32>
    %cst_16 = arith.constant 2.000000e+00 : f32
    %31 = vector.broadcast %cst_16 : f32 to vector<96x16xf32>
    %32 = arith.mulf %31, %26 : vector<96x16xf32>
    %cst_17 = arith.constant 8.99999984E-4 : f32
    %33 = vector.broadcast %cst_17 : f32 to vector<96x16xf32>
    %34 = arith.addf %32, %33 : vector<96x16xf32>
    %35 = arith.mulf %30, %34 : vector<96x16xf32>
    %36 = arith.addf %21, %22 : vector<96x16xf32>
    %cst_18 = arith.constant 9.99999974E-5 : f32
    %37 = vector.broadcast %cst_18 : f32 to vector<96x16xf32>
    %38 = arith.addf %36, %37 : vector<96x16xf32>
    %39 = arith.addf %24, %25 : vector<96x16xf32>
    %cst_19 = arith.constant 8.99999984E-4 : f32
    %40 = vector.broadcast %cst_19 : f32 to vector<96x16xf32>
    %41 = arith.addf %39, %40 : vector<96x16xf32>
    %42 = arith.mulf %38, %41 : vector<96x16xf32>
    %43 = arith.divf %35, %42 : vector<96x16xf32>
    %cst_20 = arith.constant dense<0.000000e+00> : vector<16xf32>
    %44 = vector.multi_reduction <add>, %43, %cst_20 [0] : vector<96x16xf32> to vector<16xf32>
    %45 = vector.shape_cast %44 : vector<16xf32> to vector<1x16xf32>
    %46 = vector.shape_cast %45 : vector<1x16xf32> to vector<1x1x16xf32>
    %c0_21 = arith.constant 0 : index
    %c0_22 = arith.constant 0 : index
    %c0_23 = arith.constant 0 : index
    %47 = vector.load %arg5[%c0_21, %c0_22, %c0_23] : memref<1x1x16xf32, #tpu.memory_space<vmem>>, vector<1x1x16xf32>
    tpu.vector_store %arg5[%c0_21, %c0_22, %c0_23], %46 {strides = array<i32>} : memref<1x1x16xf32, #tpu.memory_space<vmem>>, vector<1x1x16xf32>,
    return
  }
  func.func @transform_0(%arg0: i32) -> (i32, i32) {
    %c0_i32 = arith.constant 0 : i32
    %c0_i32_0 = arith.constant 0 : i32
    %c0_i32_1 = arith.constant 0 : i32
    return %c0_i32, %c0_i32_0 : i32, i32
  }
  func.func @transform_1(%arg0: i32) -> (i32, i32) {
    %c0_i32 = arith.constant 0 : i32
    %c0_i32_0 = arith.constant 0 : i32
    %c0_i32_1 = arith.constant 0 : i32
    return %c0_i32, %c0_i32_0 : i32, i32
  }
  func.func @transform_2(%arg0: i32) -> (i32, i32, i32) {
    %c0_i32 = arith.constant 0 : i32
    %c0_i32_0 = arith.constant 0 : i32
    %c0_i32_1 = arith.constant 0 : i32
    return %arg0, %c0_i32, %c0_i32_0 : i32, i32, i32
  }
  func.func @transform_3(%arg0: i32) -> (i32, i32, i32) {
    %c0_i32 = arith.constant 0 : i32
    %c0_i32_0 = arith.constant 0 : i32
    %c0_i32_1 = arith.constant 0 : i32
    return %arg0, %c0_i32, %c0_i32_0 : i32, i32, i32
  }
  func.func @transform_4(%arg0: i32) -> (i32, i32, i32) {
    %c0_i32 = arith.constant 0 : i32
    %c0_i32_0 = arith.constant 0 : i32
    %c0_i32_1 = arith.constant 0 : i32
    return %arg0, %c0_i32, %c0_i32_0 : i32, i32, i32
  }
}

</mosaic_0001>

<bundles_post_ra>
// kernel: ssim_loss.1
= control target key start
LH: loop header
LB: loop body
LE: loop exit
PB: predicated region body
PF: predicated region fallthrough
CT: control target
= control target key end

     0   :  { %9 = vsyncpa [#allocation3], 0  ;;  %s3098_s0 = inlined_call_operand.hbm [shape: f32[96,96], index: 0, kind: input, shape index: {}]   ;;  %s3099_s1 = inlined_call_operand.vmem [shape: f32[16,16], index: 1, kind: input, shape index: {}]   ;;  %s3100_s2 = inlined_call_operand.hbm [shape: f32[6,16,16], index: 2, kind: input, shape index: {}]   ;;  %s3101_s3 = inlined_call_operand.hbm [shape: f32[6,16,16], index: 3, kind: input, shape index: {}]   ;;  %s3102_s4 = inlined_call_operand.vmem [shape: f32[1,1,16], index: 4, kind: output, shape index: {}]  }
   0x1   :  { %10 = vsyncpa [#allocation5], 0  ;;  %s2434_s15 = smov [#allocation4]   ;;  %s2435_s17 = smov [#allocation2]  }
   0x2   :  { %s30_s16 = sshll.u32 %s2434_s15, 4  ;;  %s16_s18 = sshll.u32 %s2435_s17, 4  ;;  %s31_s16 = int_to_ptr.vmem [resolvable:$true] %s30_s16  ;;  %s2464_s18 = int_to_ptr.vmem [resolvable:$true] %s16_s18 }
   0x3   :  { %s2364_s21 = scalar_lea.hbm %s3100_s2, 1536 }
   0x4   :  { %p2365_p0 = scmp.ne.s32.totalorder %s3100_s2, %s2364_s21  ;;  %p2368_p1 = scmp.lt.u32.totalorder %s2364_s21, %s3100_s2 }
   0x6   :  { %p2370_p2 = pnand %p2368_p1, %p2365_p0 }
   0x8   :  { %2373 = shalt.err (!%p2370_p2)
}
   0x9   :  { %s2374_s26 = scalar_lea.vmem %s31_s16, 1536  ;;  %p2379_p4 = scmp.lt.s32.totalorder %s31_s16, %s31_s16 }
   0xa   :  { %p2375_p3 = scmp.ne.s32.totalorder %s31_s16, %s2374_s26  ;;  %p2380_p5 = scmp.lt.s32.totalorder %s2374_s26, %s2374_s26 }
   0xc   :  { %p2381_p6 = por %p2380_p5, %p2379_p4 }
   0xe   :  { %p2382_p7 = pnand %p2381_p6, %p2375_p3 }
  0x10   :  { %2385 = shalt.err (!%p2382_p7)
}
  0x11   :  { %s2436_s27 = smov 128   ;;  %s2437_s28 = smov 8  }
  0x12   :  { %36 = dma.hbm_to_vmem [thread:$0]  %s3100_s2, 1536, %s31_s16, [#allocation5], %s2436_s27, %s2436_s27, %s2437_s28  }
  0x13   :  { %s2386_s7 = scalar_lea.hbm %s3098_s0, 1536 }
  0x14   :  { %p2387_p8 = scmp.ne.s32.totalorder %s3098_s0, %s2386_s7  ;;  %p2390_p9 = scmp.lt.u32.totalorder %s2386_s7, %s3098_s0 }
  0x16   :  { %p2392_p10 = pnand %p2390_p9, %p2387_p8 }
  0x18   :  { %2395 = shalt.err (!%p2392_p10)
}
  0x19   :  { %s2396_s12 = scalar_lea.vmem %s2464_s18, 1536  ;;  %p2401_p12 = scmp.lt.s32.totalorder %s2464_s18, %s2464_s18 }
  0x1a   :  { %p2397_p11 = scmp.ne.s32.totalorder %s2464_s18, %s2396_s12  ;;  %p2402_p13 = scmp.lt.s32.totalorder %s2396_s12, %s2396_s12 }
  0x1c   :  { %p2403_p0 = por %p2402_p13, %p2401_p12 }
  0x1e   :  { %p2404_p1 = pnand %p2403_p0, %p2397_p11 }
  0x20   :  { %2407 = shalt.err (!%p2404_p1)
}
  0x21   :  { %22 = dma.hbm_to_vmem [thread:$0]  %s3098_s0, 1536, %s2464_s18, [#allocation3], %s2436_s27, %s2436_s27, %s2437_s28  }
  0x22   :  { %s2438_s14 = smov [#allocation6]   ;;  %s2408_s19 = scalar_lea.hbm %s3101_s3, 1536 }
  0x23   :  { %s42_s15 = sshll.u32 %s2438_s14, 4  ;;  %p2409_p2 = scmp.ne.s32.totalorder %s3101_s3, %s2408_s19  ;;  %s43_s15 = int_to_ptr.vmem [resolvable:$true] %s42_s15 }
  0x24   :  { %p2412_p3 = scmp.lt.u32.totalorder %s2408_s19, %s3101_s3 }
  0x26   :  { %p2414_p4 = pnand %p2412_p3, %p2409_p2 }
  0x28   :  { %2417 = shalt.err (!%p2414_p4)
}
  0x29   :  { %s2418_s24 = scalar_lea.vmem %s43_s15, 1536  ;;  %p2423_p6 = scmp.lt.s32.totalorder %s43_s15, %s43_s15 }
  0x2a   :  { %p2419_p5 = scmp.ne.s32.totalorder %s43_s15, %s2418_s24  ;;  %p2424_p7 = scmp.lt.s32.totalorder %s2418_s24, %s2418_s24 }
  0x2c   :  { %p2425_p8 = por %p2424_p7, %p2423_p6 }
  0x2e   :  { %p2426_p9 = pnand %p2425_p8, %p2419_p5 }
  0x30   :  { %2429 = shalt.err (!%p2426_p9)
}
  0x31   :  { %48 = dma.hbm_to_vmem [thread:$0]  %s3101_s3, 1536, %s43_s15, [#allocation5], %s2436_s27, %s2436_s27, %s2437_s28  }
  0x32   :  { %2430 = dma.done.wait [#allocation3], 1536  }
  0x33   :  { %2431 = vsyncadd [#allocation3], 4294965760 }
  0x34   :  { %2432 = dma.done.wait [#allocation5], 3072  }
  0x35   :  { %2433 = vsyncadd [#allocation5], 4294964224  ;;  %vm132_vm0 = vcmask 130048   ;;  %v94_v0 = vld [vmem:[%s3099_s1] sm:$0xff]  ;;  %v95_v1 = vld [vmem:[%s3099_s1 + $0x8] sm:$0xff]  ;;  %vm678_vm1 = vcmask 785408  }
  0x36   :  { %v58_v2 = vld [vmem:[#allocation4] sm:$0xff]  ;;  %v2199_v3 = vpack.c.bf16 %v95_v1, %v94_v0  ;;  %v59_v4 = vld [vmem:[#allocation4 + $0x8] sm:$0xff]  ;;  %v60_v5 = vld [vmem:[#allocation4 + $0x10] sm:$0xff]  ;;  %vm1585_vm2 = vcmask 122880  }
  0x37   :  { %1899 = vmatprep.mubr.msk.f32.mxu0 %vm132_vm0, %v58_v2  ;;  %v61_v6 = vld [vmem:[#allocation4 + $0x18] sm:$0xff]  ;;  %v62_v7 = vld [vmem:[#allocation4 + $0x20] sm:$0xff]  ;;  %v63_v9 = vld [vmem:[#allocation4 + $0x28] sm:$0xff]  ;;  %v96_v39 = vmul.f32 %v58_v2, %v58_v2  ;;  %v97_v40 = vmul.f32 %v59_v4, %v59_v4  ;;  %v98_v41 = vmul.f32 %v60_v5, %v60_v5 }
  0x38   :  { %2200 = vmatprep.subr.bf16.mxu0 %v2199_v3  ;;  %v2523_v8 = vld [vmem:[#allocation6] sm:$0xff]  ;;  %v64_v10 = vld [vmem:[#allocation4 + $0x30] sm:$0xff]  ;;  %v2528_v12 = vld [vmem:[#allocation6 + $0x8] sm:$0xff]  ;;  %v99_v42 = vmul.f32 %v61_v6, %v61_v6  ;;  %v100_v43 = vmul.f32 %v62_v7, %v62_v7  ;;  %v101_v44 = vmul.f32 %v63_v9, %v63_v9 }
  0x39   :  { %2202 = vmatpush3.bf16.msra.mxu0 %v2199_v3  ;;  %v2526_v11 = vmul.f32 %v2523_v8, %v58_v2  ;;  %v2530_v13 = vld [vmem:[#allocation6 + $0x10] sm:$0xff]  ;;  %v65_v14 = vld [vmem:[#allocation4 + $0x38] sm:$0xff]  ;;  %v2533_v15 = vmul.f32 %v2528_v12, %v59_v4  ;;  %v2540_v18 = vld [vmem:[#allocation6 + $0x20] sm:$0xff]  ;;  %v102_v45 = vmul.f32 %v64_v10, %v64_v10  ;;  %v108_v51 = vmul.f32 %v2523_v8, %v2523_v8 }
  0x3a   :  { %v2536_v16 = vmul.f32 %v2530_v13, %v60_v5  ;;  %v2538_v17 = vld [vmem:[#allocation6 + $0x18] sm:$0xff]  ;;  %v66_v19 = vld [vmem:[#allocation4 + $0x40] sm:$0xff]  ;;  %v2547_v21 = vmul.f32 %v2540_v18, %v62_v7  ;;  %v2549_v22 = vld [vmem:[#allocation6 + $0x28] sm:$0xff]  ;;  %v103_v46 = vmul.f32 %v65_v14, %v65_v14  ;;  %v109_v52 = vmul.f32 %v2528_v12, %v2528_v12 }
  0x3b   :  { %v2544_v20 = vmul.f32 %v2538_v17, %v61_v6  ;;  %v2551_v23 = vld [vmem:[#allocation6 + $0x30] sm:$0xff]  ;;  %v67_v24 = vld [vmem:[#allocation4 + $0x48] sm:$0xff]  ;;  %v2555_v25 = vmul.f32 %v2549_v22, %v63_v9  ;;  %v2560_v27 = vld [vmem:[#allocation6 + $0x38] sm:$0xff]  ;;  %v104_v47 = vmul.f32 %v66_v19, %v66_v19  ;;  %v110_v53 = vmul.f32 %v2530_v13, %v2530_v13 }
  0x3c   :  { %1900 = vmatmul.mubr.msk.f32.vlgmr.msra.gmra.mrb[0].mxu0 %vm132_vm0, %v59_v4  ;;  %v2558_v26 = vmul.f32 %v2551_v23, %v64_v10  ;;  %v2562_v28 = vld [vmem:[#allocation6 + $0x40] sm:$0xff]  ;;  %v68_v29 = vld [vmem:[#allocation4 + $0x50] sm:$0xff]  ;;  %v2565_v30 = vmul.f32 %v2560_v27, %v65_v14  ;;  %v2570_v32 = vld [vmem:[#allocation6 + $0x48] sm:$0xff]  ;;  %v105_v48 = vmul.f32 %v67_v24, %v67_v24  ;;  %v111_v54 = vmul.f32 %v2538_v17, %v2538_v17 }
  0x3d   :  { %1902 = vmatprep.mubr.msk.f32.mxu0 %vm132_vm0, %v60_v5  ;;  %v2568_v31 = vmul.f32 %v2562_v28, %v66_v19  ;;  %v2572_v33 = vld [vmem:[#allocation6 + $0x50] sm:$0xff]  ;;  %v69_v34 = vld [vmem:[#allocation4 + $0x58] sm:$0xff]  ;;  %v2575_v35 = vmul.f32 %v2570_v32, %v67_v24  ;;  %v106_v49 = vmul.f32 %v68_v29, %v68_v29  ;;  %v112_v55 = vmul.f32 %v2540_v18, %v2540_v18  ;;  %v2684_v63 = vld [vmem:[#allocation2] sm:$0xff] }
  0x3e   :  { %v2578_v36 = vmul.f32 %v2572_v33, %v68_v29  ;;  %v2580_v37 = vld [vmem:[#allocation6 + $0x58] sm:$0xff]  ;;  %v107_v50 = vmul.f32 %v69_v34, %v69_v34  ;;  %v113_v56 = vmul.f32 %v2549_v22, %v2549_v22  ;;  %v114_v57 = vmul.f32 %v2551_v23, %v2551_v23  ;;  %2013 = vmatprep.mubr.msk.f32.mxu1 %vm678_vm1, %v2684_v63 }
  0x3f   :  { %v2584_v38 = vmul.f32 %v2580_v37, %v69_v34  ;;  %v115_v58 = vmul.f32 %v2560_v27, %v2560_v27  ;;  %v116_v59 = vmul.f32 %v2562_v28, %v2562_v28  ;;  %v117_v60 = vmul.f32 %v2570_v32, %v2570_v32 }
  0x40   :  { %1903 = vmatmul.mubr.msk.f32.gmra.mrb[2].mxu0 %vm132_vm0, %v61_v6  ;;  %v118_v61 = vmul.f32 %v2572_v33, %v2572_v33  ;;  %v119_v62 = vmul.f32 %v2580_v37, %v2580_v37 }
  0x41   :  { %1905 = vmatprep.mubr.msk.f32.mxu0 %vm132_vm0, %v62_v7 }
  0x44   :  { %1906 = vmatmul.mubr.msk.f32.gmra.mrb[4].mxu0 %vm132_vm0, %v63_v9 }
  0x45   :  { %1908 = vmatprep.mubr.msk.f32.mxu0 %vm132_vm0, %v64_v10 }
  0x48   :  { %1909 = vmatmul.mubr.msk.f32.gmra.mrb[6].mxu0 %vm132_vm0, %v65_v14 }
  0x49   :  { %1911 = vmatprep.mubr.msk.f32.mxu0 %vm132_vm0, %v66_v19 }
  0x4c   :  { %1912 = vmatmul.mubr.msk.f32.gmra.mrb[8].mxu0 %vm132_vm0, %v67_v24 }
  0x4d   :  { %1914 = vmatprep.mubr.msk.f32.mxu0 %vm132_vm0, %v68_v29 }
  0x50   :  { %1915 = vmatmul.mubr.msk.f32.gmra.mrb[10].mxu0 %vm132_vm0, %v69_v34 }
  0x51   :  { %1917 = vmatprep.mubr.msk.f32.mxu0 %vm132_vm0, %v2523_v8 }
  0x54   :  { %1918 = vmatmul.mubr.msk.f32.gmra.mrb[12].mxu0 %vm132_vm0, %v2528_v12 }
  0x55   :  { %1920 = vmatprep.mubr.msk.f32.mxu0 %vm132_vm0, %v2530_v13 }
  0x58   :  { %1921 = vmatmul.mubr.msk.f32.gmra.mrb[14].mxu0 %vm132_vm0, %v2538_v17 }
  0x59   :  { %1923 = vmatprep.mubr.msk.f32.mxu0 %vm132_vm0, %v2540_v18 }
  0x5c   :  { %1924 = vmatmul.mubr.msk.f32.gmra.mrb[16].mxu0 %vm132_vm0, %v2549_v22  ;;  %v2698_v22 = vld [vmem:[#allocation2 + $0x10] sm:$0xff] }
  0x5d   :  { %1926 = vmatprep.mubr.msk.f32.mxu0 %vm132_vm0, %v2551_v23 }
  0x60   :  { %1927 = vmatmul.mubr.msk.f32.gmra.mrb[18].mxu0 %vm132_vm0, %v2560_v27  ;;  %v2706_v27 = vld [vmem:[#allocation2 + $0x20] sm:$0xff] }
  0x61   :  { %1929 = vmatprep.mubr.msk.f32.mxu0 %vm132_vm0, %v2562_v28 }
  0x64   :  { %1930 = vmatmul.mubr.msk.f32.gmra.mrb[20].mxu0 %vm132_vm0, %v2570_v32  ;;  %v2714_v32 = vld [vmem:[#allocation2 + $0x30] sm:$0xff] }
  0x65   :  { %1932 = vmatprep.mubr.msk.f32.mxu0 %vm132_vm0, %v2572_v33 }
  0x68   :  { %1933 = vmatmul.mubr.msk.f32.gmra.mrb[22].mxu0 %vm132_vm0, %v2580_v37  ;;  %v2722_v37 = vld [vmem:[#allocation2 + $0x40] sm:$0xff] }
  0x69   :  { %1935 = vmatprep.mubr.msk.f32.mxu0 %vm132_vm0, %v96_v39 }
  0x6c   :  { %1936 = vmatmul.mubr.msk.f32.gmra.mrb[24].mxu0 %vm132_vm0, %v97_v40  ;;  %v2728_v40 = vld [vmem:[#allocation2 + $0x48] sm:$0xff] }
  0x6d   :  { %1938 = vmatprep.mubr.msk.f32.mxu0 %vm132_vm0, %v98_v41 }
  0x70   :  { %1939 = vmatmul.mubr.msk.f32.gmra.mrb[26].mxu0 %vm132_vm0, %v99_v42  ;;  %v2730_v42 = vld [vmem:[#allocation2 + $0x50] sm:$0xff] }
  0x71   :  { %1941 = vmatprep.mubr.msk.f32.mxu0 %vm132_vm0, %v100_v43 }
  0x74   :  { %1942 = vmatmul.mubr.msk.f32.gmra.mrb[28].mxu0 %vm132_vm0, %v101_v44 }
  0x75   :  { %1944 = vmatprep.mubr.msk.f32.mxu0 %vm132_vm0, %v102_v45  ;;  %v2736_v45 = vld [vmem:[#allocation2 + $0x58] sm:$0xff] }
  0x78   :  { %1945 = vmatmul.mubr.msk.f32.gmra.mrb[30].mxu0 %vm132_vm0, %v103_v46 }
  0x79   :  { %1947 = vmatprep.mubr.msk.f32.mxu0 %vm132_vm0, %v104_v47 }
  0x7c   :  { %1948 = vmatmul.mubr.msk.f32.gmra.mrb[32].mxu0 %vm132_vm0, %v105_v48 }
  0x7d   :  { %1950 = vmatprep.mubr.msk.f32.mxu0 %vm132_vm0, %v106_v49 }
  0x80   :  { %1951 = vmatmul.mubr.msk.f32.gmra.mrb[34].mxu0 %vm132_vm0, %v107_v50 }
  0x81   :  { %1953 = vmatprep.mubr.msk.f32.mxu0 %vm132_vm0, %v108_v51 }
  0x84   :  { %1954 = vmatmul.mubr.msk.f32.gmra.mrb[36].mxu0 %vm132_vm0, %v109_v52 }
  0x85   :  { %1956 = vmatprep.mubr.msk.f32.mxu0 %vm132_vm0, %v110_v53 }
  0x88   :  { %1957 = vmatmul.mubr.msk.f32.gmra.mrb[38].mxu0 %vm132_vm0, %v111_v54 }
  0x89   :  { %1959 = vmatprep.mubr.msk.f32.mxu0 %vm132_vm0, %v112_v55 }
  0x8c   :  { %1960 = vmatmul.mubr.msk.f32.gmra.mrb[40].mxu0 %vm132_vm0, %v113_v56 }
  0x8d   :  { %1962 = vmatprep.mubr.msk.f32.mxu0 %vm132_vm0, %v114_v57 }
  0x90   :  { %1963 = vmatmul.mubr.msk.f32.gmra.mrb[42].mxu0 %vm132_vm0, %v115_v58 }
  0x91   :  { %1965 = vmatprep.mubr.msk.f32.mxu0 %vm132_vm0, %v116_v59 }
  0x94   :  { %1966 = vmatmul.mubr.msk.f32.gmra.mrb[44].mxu0 %vm132_vm0, %v117_v60 }
  0x95   :  { %1968 = vmatprep.mubr.msk.f32.mxu0 %vm132_vm0, %v118_v61 }
  0x98   :  { %1969 = vmatmul.mubr.msk.f32.gmra.mrb[46].mxu0 %vm132_vm0, %v119_v62 }
  0x99   :  { %1971 = vmatprep.mubr.msk.f32.mxu0 %vm132_vm0, %v2526_v11 }
  0x9c   :  { %1972 = vmatmul.mubr.msk.f32.gmra.mrb[48].mxu0 %vm132_vm0, %v2533_v15 }
  0x9d   :  { %1974 = vmatprep.mubr.msk.f32.mxu0 %vm132_vm0, %v2536_v16 }
  0xa0   :  { %1975 = vmatmul.mubr.msk.f32.gmra.mrb[50].mxu0 %vm132_vm0, %v2544_v20  ;;  %v2696_v20 = vld [vmem:[#allocation2 + $0x8] sm:$0xff] }
  0xa1   :  { %1977 = vmatprep.mubr.msk.f32.mxu0 %vm132_vm0, %v2547_v21 }
  0xa4   :  { %1978 = vmatmul.mubr.msk.f32.gmra.mrb[52].mxu0 %vm132_vm0, %v2555_v25  ;;  %v2704_v25 = vld [vmem:[#allocation2 + $0x18] sm:$0xff] }
  0xa5   :  { %1980 = vmatprep.mubr.msk.f32.mxu0 %vm132_vm0, %v2558_v26 }
  0xa8   :  { %1981 = vmatmul.mubr.msk.f32.gmra.mrb[54].mxu0 %vm132_vm0, %v2565_v30  ;;  %v2712_v30 = vld [vmem:[#allocation2 + $0x28] sm:$0xff] }
  0xa9   :  { %1983 = vmatprep.mubr.msk.f32.mxu0 %vm132_vm0, %v2568_v31 }
  0xac   :  { %1984 = vmatmul.mubr.msk.f32.gmra.mrb[56].mxu0 %vm132_vm0, %v2575_v35  ;;  %v2720_v35 = vld [vmem:[#allocation2 + $0x38] sm:$0xff] }
  0xad   :  { %1986 = vmatprep.mubr.msk.f32.mxu0 %vm132_vm0, %v2578_v36 }
  0xb0   :  { %1987 = vmatmul.mubr.msk.f32.gmra.mrb[58].mxu0 %vm132_vm0, %v2584_v38 }
  0xb1   :  { %2181 = vmatprep.mubr.msk.f32.mxu0 %vm678_vm1, %v2684_v63 }
 0x10f   :  { %v1901_v0 = vpop.f32.mrb[0].mxu0 }
 0x110   :  { %v379_v1 = vpop.f32.mrb[1].mxu0 }
 0x111   :  { %v2203_v2 = vpack.c.bf16 %v1901_v0, %v379_v1 }
 0x113   :  { %v1904_v3 = vpop.f32.mrb[2].mxu0  ;;  %2204 = vmatprep.subr.bf16.mxu1 %v2203_v2 }
 0x114   :  { %v389_v4 = vpop.f32.mrb[3].mxu0  ;;  %2206 = vmatpush3.bf16.msra.mxu1 %v2203_v2 }
 0x115   :  { %v2207_v5 = vpack.c.bf16 %v1904_v3, %v389_v4 }
 0x117   :  { %v1907_v6 = vpop.f32.mrb[4].mxu0  ;;  %2208 = vmatprep.subr.bf16.mxu1 %v2207_v5 }
 0x118   :  { %v399_v7 = vpop.f32.mrb[5].mxu0  ;;  %2210 = vmatpush3.bf16.msra.mxu1 %v2207_v5 }
 0x119   :  { %v2211_v8 = vpack.c.bf16 %v1907_v6, %v399_v7 }
 0x11b   :  { %v1910_v9 = vpop.f32.mrb[6].mxu0  ;;  %2212 = vmatprep.subr.bf16.mxu1 %v2211_v8 }
 0x11c   :  { %v409_v10 = vpop.f32.mrb[7].mxu0  ;;  %2214 = vmatpush3.bf16.msra.mxu1 %v2211_v8 }
 0x11d   :  { %v2215_v11 = vpack.c.bf16 %v1910_v9, %v409_v10 }
 0x11f   :  { %v1913_v12 = vpop.f32.mrb[8].mxu0  ;;  %2216 = vmatprep.subr.bf16.mxu1 %v2215_v11 }
 0x120   :  { %v419_v13 = vpop.f32.mrb[9].mxu0  ;;  %2218 = vmatpush3.bf16.msra.mxu1 %v2215_v11 }
 0x121   :  { %v2219_v14 = vpack.c.bf16 %v1913_v12, %v419_v13 }
 0x123   :  { %v1916_v15 = vpop.f32.mrb[10].mxu0  ;;  %2220 = vmatprep.subr.bf16.mxu1 %v2219_v14 }
 0x124   :  { %v429_v16 = vpop.f32.mrb[11].mxu0  ;;  %2222 = vmatpush3.bf16.msra.mxu1 %v2219_v14 }
 0x125   :  { %v2223_v17 = vpack.c.bf16 %v1916_v15, %v429_v16 }
 0x127   :  { %v1919_v18 = vpop.f32.mrb[12].mxu0  ;;  %2224 = vmatprep.subr.bf16.mxu1 %v2223_v17 }
 0x128   :  { %v439_v19 = vpop.f32.mrb[13].mxu0  ;;  %2226 = vmatpush3.bf16.msra.mxu1 %v2223_v17 }
 0x129   :  { %v2227_v21 = vpack.c.bf16 %v1919_v18, %v439_v19 }
 0x12b   :  { %v1922_v23 = vpop.f32.mrb[14].mxu0  ;;  %2228 = vmatprep.subr.bf16.mxu1 %v2227_v21  ;;  %2014 = vmatmul.mubr.msk.f32.vlgmr.msra.gmra.mrb[0].mxu1 %vm678_vm1, %v2696_v20 }
 0x12c   :  { %v449_v24 = vpop.f32.mrb[15].mxu0  ;;  %2230 = vmatpush3.bf16.msra.mxu1 %v2227_v21  ;;  %2016 = vmatprep.mubr.msk.f32.mxu1 %vm678_vm1, %v2698_v22 }
 0x12d   :  { %v2231_v26 = vpack.c.bf16 %v1922_v23, %v449_v24 }
 0x12f   :  { %v1925_v28 = vpop.f32.mrb[16].mxu0  ;;  %2232 = vmatprep.subr.bf16.mxu1 %v2231_v26  ;;  %2017 = vmatmul.mubr.msk.f32.gmra.mrb[2].mxu1 %vm678_vm1, %v2704_v25 }
 0x130   :  { %v459_v29 = vpop.f32.mrb[17].mxu0  ;;  %2234 = vmatpush3.bf16.msra.mxu1 %v2231_v26  ;;  %2019 = vmatprep.mubr.msk.f32.mxu1 %vm678_vm1, %v2706_v27 }
 0x131   :  { %v2235_v31 = vpack.c.bf16 %v1925_v28, %v459_v29 }
 0x133   :  { %v1928_v33 = vpop.f32.mrb[18].mxu0  ;;  %2236 = vmatprep.subr.bf16.mxu1 %v2235_v31  ;;  %2020 = vmatmul.mubr.msk.f32.gmra.mrb[4].mxu1 %vm678_vm1, %v2712_v30 }
 0x134   :  { %v469_v34 = vpop.f32.mrb[19].mxu0  ;;  %2238 = vmatpush3.bf16.msra.mxu1 %v2235_v31  ;;  %2022 = vmatprep.mubr.msk.f32.mxu1 %vm678_vm1, %v2714_v32 }
 0x135   :  { %v2239_v36 = vpack.c.bf16 %v1928_v33, %v469_v34 }
 0x137   :  { %v1931_v38 = vpop.f32.mrb[20].mxu0  ;;  %2240 = vmatprep.subr.bf16.mxu1 %v2239_v36  ;;  %2023 = vmatmul.mubr.msk.f32.gmra.mrb[6].mxu1 %vm678_vm1, %v2720_v35 }
 0x138   :  { %v479_v39 = vpop.f32.mrb[21].mxu0  ;;  %2242 = vmatpush3.bf16.msra.mxu1 %v2239_v36  ;;  %2025 = vmatprep.mubr.msk.f32.mxu1 %vm678_vm1, %v2722_v37 }
 0x139   :  { %v2243_v41 = vpack.c.bf16 %v1931_v38, %v479_v39 }
 0x13b   :  { %v1934_v43 = vpop.f32.mrb[22].mxu0  ;;  %2244 = vmatprep.subr.bf16.mxu1 %v2243_v41  ;;  %2026 = vmatmul.mubr.msk.f32.gmra.mrb[8].mxu1 %vm678_vm1, %v2728_v40 }
 0x13c   :  { %v489_v44 = vpop.f32.mrb[23].mxu0  ;;  %2246 = vmatpush3.bf16.msra.mxu1 %v2243_v41  ;;  %2028 = vmatprep.mubr.msk.f32.mxu1 %vm678_vm1, %v2730_v42 }
 0x13d   :  { %v2247_v46 = vpack.c.bf16 %v1934_v43, %v489_v44 }
 0x13f   :  { %v1937_v47 = vpop.f32.mrb[24].mxu0  ;;  %2248 = vmatprep.subr.bf16.mxu1 %v2247_v46  ;;  %2029 = vmatmul.mubr.msk.f32.gmra.mrb[10].mxu1 %vm678_vm1, %v2736_v45 }
 0x140   :  { %v499_v48 = vpop.f32.mrb[25].mxu0  ;;  %2250 = vmatpush3.bf16.msra.mxu1 %v2247_v46  ;;  %2055 = vmatprep.mubr.msk.f32.mxu1 %vm678_vm1, %v2684_v63 }
 0x141   :  { %v2251_v49 = vpack.c.bf16 %v1937_v47, %v499_v48 }
 0x143   :  { %v1940_v50 = vpop.f32.mrb[26].mxu0  ;;  %2252 = vmatprep.subr.bf16.mxu1 %v2251_v49  ;;  %2056 = vmatmul.mubr.msk.f32.vlgmr.msra.gmra.mrb[12].mxu1 %vm678_vm1, %v2696_v20 }
 0x144   :  { %v509_v51 = vpop.f32.mrb[27].mxu0  ;;  %2254 = vmatpush3.bf16.msra.mxu1 %v2251_v49  ;;  %2058 = vmatprep.mubr.msk.f32.mxu1 %vm678_vm1, %v2698_v22 }
 0x145   :  { %v2255_v52 = vpack.c.bf16 %v1940_v50, %v509_v51 }
 0x147   :  { %v1943_v53 = vpop.f32.mrb[28].mxu0  ;;  %2256 = vmatprep.subr.bf16.mxu1 %v2255_v52  ;;  %2059 = vmatmul.mubr.msk.f32.gmra.mrb[14].mxu1 %vm678_vm1, %v2704_v25 }
 0x148   :  { %v519_v54 = vpop.f32.mrb[29].mxu0  ;;  %2258 = vmatpush3.bf16.msra.mxu1 %v2255_v52  ;;  %2061 = vmatprep.mubr.msk.f32.mxu1 %vm678_vm1, %v2706_v27 }
 0x149   :  { %v2259_v55 = vpack.c.bf16 %v1943_v53, %v519_v54 }
 0x14b   :  { %v1946_v56 = vpop.f32.mrb[30].mxu0  ;;  %2260 = vmatprep.subr.bf16.mxu1 %v2259_v55  ;;  %2062 = vmatmul.mubr.msk.f32.gmra.mrb[16].mxu1 %vm678_vm1, %v2712_v30 }
 0x14c   :  { %v529_v57 = vpop.f32.mrb[31].mxu0  ;;  %2262 = vmatpush3.bf16.msra.mxu1 %v2259_v55  ;;  %2064 = vmatprep.mubr.msk.f32.mxu1 %vm678_vm1, %v2714_v32 }
 0x14d   :  { %v2263_v58 = vpack.c.bf16 %v1946_v56, %v529_v57 }
 0x14f   :  { %v1949_v59 = vpop.f32.mrb[32].mxu0  ;;  %2264 = vmatprep.subr.bf16.mxu1 %v2263_v58  ;;  %2065 = vmatmul.mubr.msk.f32.gmra.mrb[18].mxu1 %vm678_vm1, %v2720_v35 }
 0x150   :  { %v539_v60 = vpop.f32.mrb[33].mxu0  ;;  %2266 = vmatpush3.bf16.msra.mxu1 %v2263_v58  ;;  %2067 = vmatprep.mubr.msk.f32.mxu1 %vm678_vm1, %v2722_v37 }
 0x151   :  { %v2267_v61 = vpack.c.bf16 %v1949_v59, %v539_v60 }
 0x153   :  { %v1952_v62 = vpop.f32.mrb[34].mxu0  ;;  %2268 = vmatprep.subr.bf16.mxu1 %v2267_v61  ;;  %2068 = vmatmul.mubr.msk.f32.gmra.mrb[20].mxu1 %vm678_vm1, %v2728_v40 }
 0x154   :  { %v549_v0 = vpop.f32.mrb[35].mxu0  ;;  %2270 = vmatpush3.bf16.msra.mxu1 %v2267_v61  ;;  %2070 = vmatprep.mubr.msk.f32.mxu1 %vm678_vm1, %v2730_v42 }
 0x155   :  { %v2271_v1 = vpack.c.bf16 %v1952_v62, %v549_v0 }
 0x157   :  { %v1955_v2 = vpop.f32.mrb[36].mxu0  ;;  %2272 = vmatprep.subr.bf16.mxu1 %v2271_v1  ;;  %2071 = vmatmul.mubr.msk.f32.gmra.mrb[22].mxu1 %vm678_vm1, %v2736_v45 }
 0x158   :  { %v559_v3 = vpop.f32.mrb[37].mxu0  ;;  %2274 = vmatpush3.bf16.msra.mxu1 %v2271_v1  ;;  %2097 = vmatprep.mubr.msk.f32.mxu1 %vm678_vm1, %v2684_v63 }
 0x159   :  { %v2275_v4 = vpack.c.bf16 %v1955_v2, %v559_v3 }
 0x15b   :  { %v1958_v5 = vpop.f32.mrb[38].mxu0  ;;  %2276 = vmatprep.subr.bf16.mxu1 %v2275_v4  ;;  %2098 = vmatmul.mubr.msk.f32.vlgmr.msra.gmra.mrb[24].mxu1 %vm678_vm1, %v2696_v20 }
 0x15c   :  { %v569_v6 = vpop.f32.mrb[39].mxu0  ;;  %2278 = vmatpush3.bf16.msra.mxu1 %v2275_v4  ;;  %2100 = vmatprep.mubr.msk.f32.mxu1 %vm678_vm1, %v2698_v22 }
 0x15d   :  { %v2279_v7 = vpack.c.bf16 %v1958_v5, %v569_v6 }
 0x15f   :  { %v1961_v8 = vpop.f32.mrb[40].mxu0  ;;  %2280 = vmatprep.subr.bf16.mxu1 %v2279_v7  ;;  %2101 = vmatmul.mubr.msk.f32.gmra.mrb[26].mxu1 %vm678_vm1, %v2704_v25 }
 0x160   :  { %v579_v9 = vpop.f32.mrb[41].mxu0  ;;  %2282 = vmatpush3.bf16.msra.mxu1 %v2279_v7  ;;  %2103 = vmatprep.mubr.msk.f32.mxu1 %vm678_vm1, %v2706_v27 }
 0x161   :  { %v2283_v10 = vpack.c.bf16 %v1961_v8, %v579_v9 }
 0x163   :  { %v1964_v11 = vpop.f32.mrb[42].mxu0  ;;  %2284 = vmatprep.subr.bf16.mxu1 %v2283_v10  ;;  %2104 = vmatmul.mubr.msk.f32.gmra.mrb[28].mxu1 %vm678_vm1, %v2712_v30 }
 0x164   :  { %v589_v12 = vpop.f32.mrb[43].mxu0  ;;  %2286 = vmatpush3.bf16.msra.mxu1 %v2283_v10  ;;  %2106 = vmatprep.mubr.msk.f32.mxu1 %vm678_vm1, %v2714_v32 }
 0x165   :  { %v2287_v13 = vpack.c.bf16 %v1964_v11, %v589_v12 }
 0x167   :  { %v1967_v14 = vpop.f32.mrb[44].mxu0  ;;  %2288 = vmatprep.subr.bf16.mxu1 %v2287_v13  ;;  %2107 = vmatmul.mubr.msk.f32.gmra.mrb[30].mxu1 %vm678_vm1, %v2720_v35 }
 0x168   :  { %v599_v15 = vpop.f32.mrb[45].mxu0  ;;  %2290 = vmatpush3.bf16.msra.mxu1 %v2287_v13  ;;  %2109 = vmatprep.mubr.msk.f32.mxu1 %vm678_vm1, %v2722_v37 }
 0x169   :  { %v2291_v16 = vpack.c.bf16 %v1967_v14, %v599_v15 }
 0x16b   :  { %v1970_v17 = vpop.f32.mrb[46].mxu0  ;;  %2292 = vmatprep.subr.bf16.mxu1 %v2291_v16  ;;  %2110 = vmatmul.mubr.msk.f32.gmra.mrb[32].mxu1 %vm678_vm1, %v2728_v40 }
 0x16c   :  { %v609_v18 = vpop.f32.mrb[47].mxu0  ;;  %2294 = vmatpush3.bf16.msra.mxu1 %v2291_v16  ;;  %2112 = vmatprep.mubr.msk.f32.mxu1 %vm678_vm1, %v2730_v42 }
 0x16d   :  { %v2295_v19 = vpack.c.bf16 %v1970_v17, %v609_v18 }
 0x16f   :  { %v1973_v21 = vpop.f32.mrb[48].mxu0  ;;  %2296 = vmatprep.subr.bf16.mxu1 %v2295_v19  ;;  %2113 = vmatmul.mubr.msk.f32.gmra.mrb[34].mxu1 %vm678_vm1, %v2736_v45 }
 0x170   :  { %v619_v23 = vpop.f32.mrb[49].mxu0  ;;  %2298 = vmatpush3.bf16.msra.mxu1 %v2295_v19  ;;  %2139 = vmatprep.mubr.msk.f32.mxu1 %vm678_vm1, %v2684_v63 }
 0x171   :  { %v2299_v24 = vpack.c.bf16 %v1973_v21, %v619_v23 }
 0x173   :  { %v1976_v26 = vpop.f32.mrb[50].mxu0  ;;  %2300 = vmatprep.subr.bf16.mxu0 %v2299_v24  ;;  %2323 = vmatprep.subr.bf16.mxu1 %v2299_v24 }
 0x174   :  { %v629_v28 = vpop.f32.mrb[51].mxu0  ;;  %2140 = vmatmul.mubr.msk.f32.vlgmr.msra.gmra.mrb[36].mxu1 %vm678_vm1, %v2696_v20  ;;  %2302 = vmatpush3.bf16.msra.mxu0 %v2299_v24 }
 0x175   :  { %v2303_v29 = vpack.c.bf16 %v1976_v26, %v629_v28  ;;  %2329 = vmatpush3.bf16.msra.mxu1 %v2299_v24  ;;  %2142 = vmatprep.mubr.msk.f32.mxu1 %vm678_vm1, %v2698_v22 }
 0x177   :  { %v1979_v31 = vpop.f32.mrb[52].mxu0  ;;  %2304 = vmatprep.subr.bf16.mxu0 %v2303_v29  ;;  %2324 = vmatprep.subr.bf16.mxu1 %v2303_v29 }
 0x178   :  { %v639_v33 = vpop.f32.mrb[53].mxu0  ;;  %2306 = vmatpush3.bf16.msra.mxu0 %v2303_v29  ;;  %2143 = vmatmul.mubr.msk.f32.gmra.mrb[38].mxu1 %vm678_vm1, %v2704_v25 }
 0x179   :  { %v2307_v63 = vpack.c.bf16 %v1979_v31, %v639_v33  ;;  %2330 = vmatpush3.bf16.msra.mxu1 %v2303_v29  ;;  %2145 = vmatprep.mubr.msk.f32.mxu1 %vm678_vm1, %v2706_v27 }
 0x17b   :  { %v1982_v34 = vpop.f32.mrb[54].mxu0  ;;  %2308 = vmatprep.subr.bf16.mxu0 %v2307_v63  ;;  %2325 = vmatprep.subr.bf16.mxu1 %v2307_v63 }
 0x17c   :  { %v649_v36 = vpop.f32.mrb[55].mxu0  ;;  %2310 = vmatpush3.bf16.msra.mxu0 %v2307_v63  ;;  %2146 = vmatmul.mubr.msk.f32.gmra.mrb[40].mxu1 %vm678_vm1, %v2712_v30 }
 0x17d   :  { %v2311_v38 = vpack.c.bf16 %v1982_v34, %v649_v36  ;;  %2331 = vmatpush3.bf16.msra.mxu1 %v2307_v63  ;;  %2148 = vmatprep.mubr.msk.f32.mxu1 %vm678_vm1, %v2714_v32 }
 0x17f   :  { %v1985_v39 = vpop.f32.mrb[56].mxu0  ;;  %2312 = vmatprep.subr.bf16.mxu0 %v2311_v38  ;;  %2326 = vmatprep.subr.bf16.mxu1 %v2311_v38 }
 0x180   :  { %v659_v41 = vpop.f32.mrb[57].mxu0  ;;  %2314 = vmatpush3.bf16.msra.mxu0 %v2311_v38  ;;  %2149 = vmatmul.mubr.msk.f32.gmra.mrb[42].mxu1 %vm678_vm1, %v2720_v35 }
 0x181   :  { %v2315_v43 = vpack.c.bf16 %v1985_v39, %v659_v41  ;;  %2332 = vmatpush3.bf16.msra.mxu1 %v2311_v38  ;;  %2151 = vmatprep.mubr.msk.f32.mxu1 %vm678_vm1, %v2722_v37 }
 0x183   :  { %v1988_v44 = vpop.f32.mrb[58].mxu0  ;;  %2316 = vmatprep.subr.bf16.mxu0 %v2315_v43  ;;  %2327 = vmatprep.subr.bf16.mxu1 %v2315_v43 }
 0x184   :  { %v669_v46 = vpop.f32.mrb[59].mxu0  ;;  %2318 = vmatpush3.bf16.msra.mxu0 %v2315_v43  ;;  %2152 = vmatmul.mubr.msk.f32.gmra.mrb[44].mxu1 %vm678_vm1, %v2728_v40 }
 0x185   :  { %v2319_v47 = vpack.c.bf16 %v1988_v44, %v669_v46  ;;  %2333 = vmatpush3.bf16.msra.mxu1 %v2315_v43  ;;  %2154 = vmatprep.mubr.msk.f32.mxu1 %vm678_vm1, %v2730_v42 }
 0x187   :  { %2320 = vmatprep.subr.bf16.mxu0 %v2319_v47  ;;  %2328 = vmatprep.subr.bf16.mxu1 %v2319_v47 }
 0x188   :  { %2322 = vmatpush3.bf16.msra.mxu0 %v2319_v47  ;;  %2155 = vmatmul.mubr.msk.f32.gmra.mrb[46].mxu1 %vm678_vm1, %v2736_v45 }
 0x189   :  { %2334 = vmatpush3.bf16.msra.mxu1 %v2319_v47  ;;  %2187 = vmatprep.mubr.msk.f32.mxu1 %vm678_vm1, %v2706_v27 }
 0x18b   :  { %2182 = vmatmul.mubr.msk.f32.vlgmr.msra.gmra.mrb[60].mxu0 %vm678_vm1, %v2696_v20 }
 0x18c   :  { %2184 = vmatprep.mubr.msk.f32.mxu0 %vm678_vm1, %v2698_v22  ;;  %2188 = vmatmul.mubr.msk.f32.vlgmr.msra.gmra.mrb[48].mxu1 %vm678_vm1, %v2712_v30 }
 0x18d   :  { %2190 = vmatprep.mubr.msk.f32.mxu1 %vm678_vm1, %v2714_v32 }
 0x18f   :  { %2185 = vmatmul.mubr.msk.f32.gmra.mrb[62].mxu0 %vm678_vm1, %v2704_v25 }
 0x190   :  { %2191 = vmatmul.mubr.msk.f32.gmra.mrb[50].mxu1 %vm678_vm1, %v2720_v35 }
 0x191   :  { %2193 = vmatprep.mubr.msk.f32.mxu1 %vm678_vm1, %v2722_v37 }
 0x194   :  { %2194 = vmatmul.mubr.msk.f32.gmra.mrb[52].mxu1 %vm678_vm1, %v2728_v40 }
 0x195   :  { %2196 = vmatprep.mubr.msk.f32.mxu1 %vm678_vm1, %v2730_v42 }
 0x198   :  { %2197 = vmatmul.mubr.msk.f32.gmra.mrb[54].mxu1 %vm678_vm1, %v2736_v45 }
 0x1fe   :  { %v2015_v20 = vpop.f32.mrb[0].mxu1 }
 0x1ff   :  { %v781_v22 = vpop.f32.mrb[1].mxu1  ;;  %v2834_v40 = vmul.f32 %v2015_v20, %v2015_v20 }
 0x200   :  { %v2840_v54 = vmul.f32 %v781_v22, %v781_v22 }
 0x202   :  { %v2018_v27 = vpop.f32.mrb[2].mxu1 }
 0x203   :  { %v791_v30 = vpop.f32.mrb[3].mxu1  ;;  %v2854_v60 = vmul.f32 %v2018_v27, %v2018_v27 }
 0x204   :  { %v2860_v1 = vmul.f32 %v791_v30, %v791_v30 }
 0x206   :  { %v2021_v25 = vpop.f32.mrb[4].mxu1 }
 0x207   :  { %v801_v32 = vpop.f32.mrb[5].mxu1  ;;  %v2874_v7 = vmul.f32 %v2021_v25, %v2021_v25 }
 0x208   :  { %v2880_v11 = vmul.f32 %v801_v32, %v801_v32 }
 0x20a   :  { %v2024_v48 = vpop.f32.mrb[6].mxu1 }
 0x20b   :  { %v811_v35 = vpop.f32.mrb[7].mxu1  ;;  %v2894_v17 = vmul.f32 %v2024_v48, %v2024_v48 }
 0x20c   :  { %v2900_v23 = vmul.f32 %v811_v35, %v811_v35 }
 0x20e   :  { %v2027_v49 = vpop.f32.mrb[8].mxu1 }
 0x20f   :  { %v821_v50 = vpop.f32.mrb[9].mxu1  ;;  %v2914_v33 = vmul.f32 %v2027_v49, %v2027_v49 }
 0x210   :  { %v2920_v38 = vmul.f32 %v821_v50, %v821_v50 }
 0x212   :  { %v2030_v37 = vpop.f32.mrb[10].mxu1 }
 0x213   :  { %v831_v51 = vpop.f32.mrb[11].mxu1  ;;  %v2934_v47 = vmul.f32 %v2030_v37, %v2030_v37 }
 0x215   :  { %3111 = vst [vmem:[#allocation11_spill] sm:$0xff] %v2934_v47 }
 0x216   :  { %v2057_v52 = vpop.f32.mrb[12].mxu1 }
 0x217   :  { %v2836_v53 = vmul.f32 %v2057_v52, %v2057_v52  ;;  %v2838_v42 = vmul.f32 %v2057_v52, %v2015_v20  ;;  %v906_v45 = vpop.f32.mrb[13].mxu1 }
 0x218   :  { %v2842_v55 = vmul.f32 %v906_v45, %v906_v45  ;;  %v2844_v56 = vmul.f32 %v906_v45, %v781_v22 }
 0x219   :  { %v2848_v57 = vadd.f32 %v2836_v53, %v2834_v40 }
 0x21a   :  { %v2852_v58 = vadd.f32 %v2842_v55, %v2840_v54  ;;  %v2060_v59 = vpop.f32.mrb[14].mxu1 }
 0x21b   :  { %v2856_v61 = vmul.f32 %v2060_v59, %v2060_v59  ;;  %v2858_v62 = vmul.f32 %v2060_v59, %v2018_v27  ;;  %v916_v0 = vpop.f32.mrb[15].mxu1 }
 0x21c   :  { %v2862_v2 = vmul.f32 %v916_v0, %v916_v0  ;;  %v2864_v3 = vmul.f32 %v916_v0, %v791_v30  ;;  %v2940_v30 = vmul.f32 %v831_v51, %v831_v51 }
 0x21d   :  { %3109 = vst [vmem:[#allocation9_spill] sm:$0xff] %v2858_v62  ;;  %v2868_v4 = vadd.f32 %v2856_v61, %v2854_v60 }
 0x21e   :  { %3110 = vst [vmem:[#allocation10_spill] sm:$0xff] %v2864_v3  ;;  %v2872_v5 = vadd.f32 %v2862_v2, %v2860_v1  ;;  %v2063_v6 = vpop.f32.mrb[16].mxu1  ;;  %3112 = vst [vmem:[#allocation12_spill] sm:$0xff] %v2940_v30 }
 0x21f   :  { %v2876_v8 = vmul.f32 %v2063_v6, %v2063_v6  ;;  %v2878_v9 = vmul.f32 %v2063_v6, %v2021_v25  ;;  %v926_v10 = vpop.f32.mrb[17].mxu1 }
 0x220   :  { %v2882_v12 = vmul.f32 %v926_v10, %v926_v10  ;;  %v2884_v13 = vmul.f32 %v926_v10, %v801_v32 }
 0x221   :  { %v2888_v14 = vadd.f32 %v2876_v8, %v2874_v7 }
 0x222   :  { %v2892_v15 = vadd.f32 %v2882_v12, %v2880_v11  ;;  %v2066_v16 = vpop.f32.mrb[18].mxu1 }
 0x223   :  { %v2896_v18 = vmul.f32 %v2066_v16, %v2066_v16  ;;  %v2898_v19 = vmul.f32 %v2066_v16, %v2024_v48  ;;  %v936_v21 = vpop.f32.mrb[19].mxu1 }
 0x224   :  { %v2902_v24 = vmul.f32 %v936_v21, %v936_v21  ;;  %v2904_v26 = vmul.f32 %v936_v21, %v811_v35 }
 0x225   :  { %v2908_v28 = vadd.f32 %v2896_v18, %v2894_v17 }
 0x226   :  { %v2912_v29 = vadd.f32 %v2902_v24, %v2900_v23  ;;  %v2069_v31 = vpop.f32.mrb[20].mxu1 }
 0x227   :  { %v2916_v63 = vmul.f32 %v2069_v31, %v2069_v31  ;;  %v2918_v34 = vmul.f32 %v2069_v31, %v2027_v49  ;;  %v946_v36 = vpop.f32.mrb[21].mxu1 }
 0x228   :  { %v2922_v39 = vmul.f32 %v946_v36, %v946_v36  ;;  %v2924_v41 = vmul.f32 %v946_v36, %v821_v50 }
 0x229   :  { %v2928_v43 = vadd.f32 %v2916_v63, %v2914_v33 }
 0x22a   :  { %v2932_v44 = vadd.f32 %v2922_v39, %v2920_v38  ;;  %v2072_v46 = vpop.f32.mrb[22].mxu1 }
 0x22b   :  { %v2936_v20 = vmul.f32 %v2072_v46, %v2072_v46  ;;  %v2938_v22 = vmul.f32 %v2072_v46, %v2030_v37  ;;  %v956_v27 = vpop.f32.mrb[23].mxu1 }
 0x22c   :  { %v2942_v25 = vmul.f32 %v956_v27, %v956_v27  ;;  %v2944_v32 = vmul.f32 %v956_v27, %v831_v51 }
 0x22d   :  { %v2948_v48 = vadd.f32 %v2936_v20, %v2934_v47  ;;  %v1485_v47 = vadd.f32 0.0001, %v2848_v57 }
 0x22e   :  { %3113 = vst [vmem:[#allocation13_spill] sm:$0xff] %v2944_v32  ;;  %v2952_v35 = vadd.f32 %v2942_v25, %v2940_v30  ;;  %v2099_v49 = vpop.f32.mrb[24].mxu1 }
 0x22f   :  { %v1377_v50 = vsub.f32 %v2099_v49, %v2834_v40  ;;  %v1031_v37 = vpop.f32.mrb[25].mxu1  ;;  %v1415_v40 = vmul.f32 2.0, %v2858_v62 }
 0x230   :  { %v1376_v52 = vsub.f32 %v1031_v37, %v2840_v54 }
 0x231   :  { %v2999_v57 = vadd.f32 0.0001, %v1415_v40 }
 0x232   :  { %v2102_v45 = vpop.f32.mrb[26].mxu1 }
 0x233   :  { %v1379_v59 = vsub.f32 %v2102_v45, %v2854_v60  ;;  %v1041_v0 = vpop.f32.mrb[27].mxu1 }
 0x234   :  { %v1378_v51 = vsub.f32 %v1041_v0, %v2860_v1  ;;  %v1413_v1 = vmul.f32 2.0, %v2838_v42 }
 0x236   :  { %v2105_v6 = vpop.f32.mrb[28].mxu1 }
 0x237   :  { %v1381_v10 = vsub.f32 %v2105_v6, %v2874_v7  ;;  %v1051_v16 = vpop.f32.mrb[29].mxu1  ;;  %v1412_v7 = vmul.f32 2.0, %v2844_v56 }
 0x238   :  { %v1380_v21 = vsub.f32 %v1051_v16, %v2880_v11 }
 0x23a   :  { %v2960_v31 = vpop.f32.mrb[30].mxu1 }
 0x23b   :  { %v2964_v36 = vpop.f32.mrb[31].mxu1 }
 0x23e   :  { %v2968_v60 = vpop.f32.mrb[32].mxu1 }
 0x23f   :  { %v2972_v46 = vpop.f32.mrb[33].mxu1 }
 0x242   :  { %v2976_v11 = vpop.f32.mrb[34].mxu1 }
 0x243   :  { %3114 = vst [vmem:[#allocation14_spill] sm:$0xff] %v2976_v11  ;;  %v2980_v49 = vpop.f32.mrb[35].mxu1 }
 0x247   :  { %v2141_v45 = vpop.f32.mrb[36].mxu1 }
 0x248   :  { %v1389_v0 = vsub.f32 %v2141_v45, %v2836_v53  ;;  %v1156_v6 = vpop.f32.mrb[37].mxu1  ;;  %v1484_v53 = vadd.f32 0.0001, %v2852_v58  ;;  %v1414_v45 = vmul.f32 2.0, %v2864_v3  ;;  %v1487_v58 = vadd.f32 0.0001, %v2868_v4 }
 0x249   :  { %v1388_v16 = vsub.f32 %v1156_v6, %v2842_v55  ;;  %v1416_v3 = vmul.f32 2.0, %v2884_v13  ;;  %v1489_v4 = vadd.f32 0.0001, %v2888_v14  ;;  %v1420_v14 = vmul.f32 2.0, %v2924_v41 }
 0x24a   :  { %v1497_v54 = vadd.f32 %v1389_v0, %v1377_v50  ;;  %v2994_v50 = vadd.f32 0.0001, %v1413_v1  ;;  %v1417_v0 = vmul.f32 2.0, %v2878_v9  ;;  %v3004_v1 = vadd.f32 0.0001, %v1414_v45 }
 0x24b   :  { %v1496_v32 = vadd.f32 %v1388_v16, %v1376_v52  ;;  %v2144_v27 = vpop.f32.mrb[38].mxu1  ;;  %v2997_v16 = vadd.f32 0.0001, %v1412_v7  ;;  %v3013_v45 = vadd.f32 0.0001, %v1416_v3  ;;  %v3115_v3 = vsub.f32 %v2960_v31, %v2894_v17 }
 0x24c   :  { %v1509_v11 = vadd.f32 0.0009, %v1497_v54  ;;  %v1391_v37 = vsub.f32 %v2144_v27, %v2856_v61  ;;  %v1166_v30 = vpop.f32.mrb[39].mxu1  ;;  %v3008_v40 = vadd.f32 0.0001, %v1417_v0  ;;  %v1421_v0 = vmul.f32 2.0, %v2918_v34 }
 0x24d   :  { %v1508_v55 = vadd.f32 0.0009, %v1496_v32  ;;  %v1390_v6 = vsub.f32 %v1166_v30, %v2862_v2  ;;  %v1493_v17 = vadd.f32 0.0001, %v2928_v43 }
 0x24e   :  { %v1521_v62 = vmul.f32 %v1509_v11, %v1485_v47  ;;  %v1499_v52 = vadd.f32 %v1391_v37, %v1379_v59  ;;  %v1486_v47 = vadd.f32 0.0001, %v2872_v5 }
 0x24f   :  { %v1520_v54 = vmul.f32 %v1508_v55, %v1484_v53  ;;  %v1498_v61 = vadd.f32 %v1390_v6, %v1378_v51  ;;  %v2147_v27 = vpop.f32.mrb[40].mxu1  ;;  %v1419_v51 = vmul.f32 2.0, %v2898_v19  ;;  %v1418_v53 = vmul.f32 2.0, %v2904_v26 }
 0x250   :  { %v1511_v32 = vadd.f32 0.0009, %v1499_v52  ;;  %v1393_v2 = vsub.f32 %v2147_v27, %v2876_v8  ;;  %v1176_v30 = vpop.f32.mrb[41].mxu1  ;;  %2340 = vrcp.f32 %v1521_v62 }
 0x251   :  { %v1510_v59 = vadd.f32 0.0009, %v1498_v61  ;;  %v1392_v7 = vsub.f32 %v1176_v30, %v2882_v12  ;;  %v1488_v12 = vadd.f32 0.0001, %v2892_v15  ;;  %v3116_v15 = vsub.f32 %v2964_v36, %v2900_v23 }
 0x252   :  { %v1523_v11 = vmul.f32 %v1511_v32, %v1487_v58  ;;  %v1501_v37 = vadd.f32 %v1393_v2, %v1381_v10  ;;  %v3019_v58 = vadd.f32 0.0001, %v1419_v51  ;;  %v1491_v2 = vadd.f32 0.0001, %v2908_v28 }
 0x253   :  { %v1522_v55 = vmul.f32 %v1510_v59, %v1486_v47  ;;  %v1500_v8 = vadd.f32 %v1392_v7, %v1380_v21  ;;  %v2150_v6 = vpop.f32.mrb[42].mxu1  ;;  %v3117_v23 = vsub.f32 %v2968_v60, %v2914_v33  ;;  %2342 = vrcp.f32 %v1520_v54 }
 0x254   :  { %v1513_v52 = vadd.f32 0.0009, %v1501_v37  ;;  %v1395_v5 = vsub.f32 %v2150_v6, %v2896_v18  ;;  %v1186_v61 = vpop.f32.mrb[43].mxu1  ;;  %v3026_v18 = vadd.f32 0.0001, %v1418_v53  ;;  %v3118_v6 = vsub.f32 %v2972_v46, %v2920_v38 }
 0x255   :  { %v1512_v27 = vadd.f32 0.0009, %v1500_v8  ;;  %v1394_v10 = vsub.f32 %v1186_v61, %v2902_v24  ;;  %v1490_v24 = vadd.f32 0.0001, %v2912_v29  ;;  %v3037_v53 = vadd.f32 0.0001, %v1420_v14 }
 0x256   :  { %v1525_v32 = vmul.f32 %v1513_v52, %v1489_v4  ;;  %v1503_v21 = vadd.f32 %v1395_v5, %v3115_v3  ;;  %v3033_v4 = vadd.f32 0.0001, %v1421_v0  ;;  %v1492_v29 = vadd.f32 0.0001, %v2932_v44  ;;  %v3120_v0 = vld [vmem:[#allocation11_spill] sm:$0xff] }
 0x257   :  { %v1524_v30 = vmul.f32 %v1512_v27, %v1488_v12  ;;  %v1502_v47 = vadd.f32 %v1394_v10, %v3116_v15  ;;  %v2153_v59 = vpop.f32.mrb[44].mxu1  ;;  %v3047_v5 = vmul.f32 2.0, %v2938_v22  ;;  %2344 = vrcp.f32 %v1523_v11  ;;  %v3119_v12 = vld [vmem:[#allocation14_spill] sm:$0xff] }
 0x258   :  { %v1515_v7 = vadd.f32 0.0009, %v1503_v21  ;;  %v1397_v51 = vsub.f32 %v2153_v59, %v2916_v63  ;;  %v1196_v37 = vpop.f32.mrb[45].mxu1  ;;  %v1495_v33 = vadd.f32 0.0001, %v2948_v48  ;;  %2346 = vrcp.f32 %v1525_v32  ;;  %v3122_v48 = vld [vmem:[#allocation12_spill] sm:$0xff] }
 0x259   :  { %v1514_v31 = vadd.f32 0.0009, %v1502_v47  ;;  %v1396_v28 = vsub.f32 %v1196_v37, %v2922_v39  ;;  %v1494_v54 = vadd.f32 0.0001, %v2952_v35  ;;  %2348 = vrcp.f32 %v1524_v30 }
 0x25a   :  { %v1527_v8 = vmul.f32 %v1515_v7, %v1491_v2  ;;  %v1505_v36 = vadd.f32 %v1397_v51, %v3117_v23  ;;  %v3121_v27 = vsub.f32 %v3119_v12, %v3120_v0  ;;  %2350 = vrcp.f32 %v1522_v55  ;;  %v3124_v51 = vld [vmem:[#allocation9_spill] sm:$0xff]  ;;  %v3125_v23 = vld [vmem:[#allocation10_spill] sm:$0xff] }
 0x25b   :  { %v1526_v63 = vmul.f32 %v1514_v31, %v1490_v24  ;;  %v1504_v52 = vadd.f32 %v1396_v28, %v3118_v6  ;;  %v2156_v43 = vpop.f32.mrb[46].mxu1  ;;  %v3123_v32 = vsub.f32 %v2980_v49, %v3122_v48 }
 0x25c   :  { %v1517_v39 = vadd.f32 0.0009, %v1505_v36  ;;  %v1399_v62 = vsub.f32 %v2156_v43, %v2936_v20  ;;  %v1206_v61 = vpop.f32.mrb[47].mxu1  ;;  %2352 = vrcp.f32 %v1527_v8  ;;  %v2341_v8 = vpop.eup %2340 }
 0x25d   :  { %v1516_v60 = vadd.f32 0.0009, %v1504_v52  ;;  %v1398_v44 = vsub.f32 %v1206_v61, %v2942_v25  ;;  %2354 = vrcp.f32 %v1526_v63 }
 0x25e   :  { %v2183_v38 = vpop.f32.mrb[60].mxu0  ;;  %v1529_v46 = vmul.f32 %v1517_v39, %v1493_v17  ;;  %v1507_v10 = vadd.f32 %v1399_v62, %v3121_v27 }
 0x25f   :  { %v1401_v11 = vsub.f32 %v2183_v38, %v2838_v42  ;;  %v1281_v20 = vpop.f32.mrb[61].mxu0  ;;  %v1528_v14 = vmul.f32 %v1516_v60, %v1492_v29  ;;  %v1506_v3 = vadd.f32 %v1398_v44, %v3123_v32  ;;  %v2189_v21 = vpop.f32.mrb[48].mxu1 }
 0x260   :  { %v1400_v25 = vsub.f32 %v1281_v20, %v2844_v56  ;;  %v1519_v35 = vadd.f32 0.0009, %v1507_v10  ;;  %v1405_v2 = vsub.f32 %v2189_v21, %v2878_v9  ;;  %v1301_v30 = vpop.f32.mrb[49].mxu1  ;;  %2356 = vrcp.f32 %v1529_v46 }
 0x261   :  { %v1437_v15 = vmul.f32 2.0, %v1401_v11  ;;  %v1518_v47 = vadd.f32 0.0009, %v1506_v3  ;;  %v1404_v55 = vsub.f32 %v1301_v30, %v2884_v13  ;;  %2358 = vrcp.f32 %v1528_v14  ;;  %v2343_v13 = vpop.eup %2342 }
 0x262   :  { %v1436_v42 = vmul.f32 2.0, %v1400_v25  ;;  %v2186_v59 = vpop.f32.mrb[62].mxu0  ;;  %v1531_v24 = vmul.f32 %v1519_v35, %v1495_v33  ;;  %v1441_v7 = vmul.f32 2.0, %v1405_v2  ;;  %v2345_v39 = vpop.eup %2344  ;;  %v3126_v35 = vld [vmem:[#allocation13_spill] sm:$0xff] }
 0x263   :  { %v1449_v49 = vadd.f32 0.0009, %v1437_v15  ;;  %v1403_v37 = vsub.f32 %v2186_v59, %v3124_v51  ;;  %v1291_v17 = vpop.f32.mrb[63].mxu0  ;;  %v1530_v31 = vmul.f32 %v1518_v47, %v1494_v54  ;;  %v1440_v56 = vmul.f32 2.0, %v1404_v55  ;;  %v2192_v28 = vpop.f32.mrb[50].mxu1 }
 0x264   :  { %v1448_v9 = vadd.f32 0.0009, %v1436_v42  ;;  %v1402_v36 = vsub.f32 %v1291_v17, %v3125_v23  ;;  %v1453_v29 = vadd.f32 0.0009, %v1441_v7  ;;  %v1311_v63 = vpop.f32.mrb[51].mxu1  ;;  %2360 = vrcp.f32 %v1531_v24  ;;  %v2347_v44 = vpop.eup %2346 }
 0x265   :  { %v1461_v6 = vmul.f32 %v1449_v49, %v2994_v50  ;;  %v1439_v52 = vmul.f32 2.0, %v1403_v37  ;;  %v1452_v43 = vadd.f32 0.0009, %v1440_v56  ;;  %v1407_v60 = vsub.f32 %v2192_v28, %v2898_v19  ;;  %v2349_v50 = vpop.eup %2348 }
 0x266   :  { %v1460_v62 = vmul.f32 %v1448_v9, %v2997_v16  ;;  %v1438_v61 = vmul.f32 2.0, %v1402_v36  ;;  %v1465_v33 = vmul.f32 %v1453_v29, %v3008_v40  ;;  %v1406_v12 = vsub.f32 %v1311_v63, %v2904_v26  ;;  %v2351_v16 = vpop.eup %2350 }
 0x267   :  { %v1535_v54 = vmul.f32 %v2341_v8, %v1461_v6  ;;  %v1451_v38 = vadd.f32 0.0009, %v1439_v52  ;;  %v1464_v46 = vmul.f32 %v1452_v43, %v3013_v45  ;;  %v2195_v0 = vpop.f32.mrb[52].mxu1  ;;  %v1443_v20 = vmul.f32 2.0, %v1407_v60  ;;  %v2353_v3 = vpop.eup %2352 }
 0x268   :  { %v1533_v27 = vmul.f32 %v2343_v13, %v1460_v62  ;;  %v1450_v10 = vadd.f32 0.0009, %v1438_v61  ;;  %v1543_v11 = vmul.f32 %v2347_v44, %v1465_v33  ;;  %v1321_v14 = vpop.f32.mrb[53].mxu1  ;;  %v1442_v32 = vmul.f32 2.0, %v1406_v12  ;;  %v2355_v25 = vpop.eup %2354 }
 0x269   :  { %v1557_v48 = vsel %vm132_vm0, %v1535_v54, 0.0  ;;  %v1463_v40 = vmul.f32 %v1451_v38, %v2999_v57  ;;  %v1541_v19 = vmul.f32 %v2349_v50, %v1464_v46  ;;  %2362 = vrcp.f32 %v1530_v31 }
 0x26a   :  { %v1556_v21 = vsel %vm132_vm0, %v1533_v27, 0.0  ;;  %v1462_v45 = vmul.f32 %v1450_v10, %v3004_v1  ;;  %v1455_v26 = vadd.f32 0.0009, %v1443_v20  ;;  %v1422_v2 = vmul.f32 2.0, %v3126_v35  ;;  %v2357_v42 = vpop.eup %2356 }
 0x26b   :  { %v1558_v30 = vadd.f32 %v1557_v48, %v1556_v21  ;;  %v1539_v15 = vmul.f32 %v2345_v39, %v1463_v40  ;;  %v1454_v47 = vadd.f32 0.0009, %v1442_v32  ;;  %v2198_v55 = vpop.f32.mrb[54].mxu1  ;;  %v1409_v24 = vsub.f32 %v2195_v0, %v2918_v34  ;;  %v2359_v31 = vpop.eup %2358 }
 0x26c   :  { %v1537_v59 = vmul.f32 %v2351_v16, %v1462_v45  ;;  %v1467_v57 = vmul.f32 %v1455_v26, %v3019_v58  ;;  %v1408_v7 = vsub.f32 %v1321_v14, %v2924_v41  ;;  %v1331_v49 = vpop.f32.mrb[55].mxu1  ;;  %v1435_v1 = vadd.f32 0.0001, %v3047_v5 }
 0x26d   :  { %v1466_v51 = vmul.f32 %v1454_v47, %v3026_v18  ;;  %v1411_v37 = vsub.f32 %v2198_v55, %v2938_v22  ;;  %v1410_v17 = vsub.f32 %v1331_v49, %v3126_v35  ;;  %v1445_v8 = vmul.f32 2.0, %v1409_v24 }
 0x26e   :  { %v1559_v56 = vsel %vm132_vm0, %v1537_v59, 0.0  ;;  %v1547_v28 = vmul.f32 %v2353_v3, %v1467_v57  ;;  %v1444_v9 = vmul.f32 2.0, %v1408_v7  ;;  %v2361_v58 = vpop.eup %2360  ;;  %v1561_v29 = vsel %vm132_vm0, %v1539_v15, 0.0 }
 0x26f   :  { %v1560_v23 = vadd.f32 %v1559_v56, %v1558_v30  ;;  %v1545_v34 = vmul.f32 %v2355_v25, %v1466_v51  ;;  %v1447_v36 = vmul.f32 2.0, %v1411_v37  ;;  %v1446_v41 = vmul.f32 2.0, %v1410_v17 }
 0x270   :  { %v1457_v5 = vadd.f32 0.0009, %v1445_v8  ;;  %v1456_v63 = vadd.f32 0.0009, %v1444_v9  ;;  %v1434_v18 = vadd.f32 0.0001, %v1422_v2 }
 0x271   :  { %v1562_v13 = vadd.f32 %v1561_v29, %v1560_v23  ;;  %v1459_v22 = vadd.f32 0.0009, %v1447_v36  ;;  %v1458_v6 = vadd.f32 0.0009, %v1446_v41  ;;  %v1563_v52 = vsel %vm132_vm0, %v1541_v19, 0.0 }
 0x272   :  { %v1469_v43 = vmul.f32 %v1457_v5, %v3033_v4  ;;  %v1468_v39 = vmul.f32 %v1456_v63, %v3037_v53  ;;  %v1565_v44 = vsel %vm132_vm0, %v1543_v11, 0.0  ;;  %v1567_v50 = vsel %vm132_vm0, %v1545_v34, 0.0 }
 0x273   :  { %v1564_v62 = vadd.f32 %v1563_v52, %v1562_v13  ;;  %v1471_v61 = vmul.f32 %v1459_v22, %v1435_v1  ;;  %v1470_v33 = vmul.f32 %v1458_v6, %v1434_v18  ;;  %v2363_v60 = vpop.eup %2362  ;;  %v1569_v10 = vsel %vm132_vm0, %v1547_v28, 0.0 }
 0x274   :  { %v1551_v54 = vmul.f32 %v2357_v42, %v1469_v43  ;;  %v1549_v38 = vmul.f32 %v2359_v31, %v1468_v39 }
 0x275   :  { %v1566_v46 = vadd.f32 %v1565_v44, %v1564_v62  ;;  %v1555_v12 = vmul.f32 %v2361_v58, %v1471_v61  ;;  %v1553_v0 = vmul.f32 %v2363_v60, %v1470_v33 }
 0x276   :  { %v1571_v4 = vsel %vm132_vm0, %v1549_v38, 0.0  ;;  %v1573_v14 = vsel %vm132_vm0, %v1551_v54, 0.0 }
 0x277   :  { %v1568_v27 = vadd.f32 %v1567_v50, %v1566_v46  ;;  %v1575_v48 = vsel %vm132_vm0, %v1553_v0, 0.0  ;;  %v1577_v40 = vsel %vm132_vm0, %v1555_v12, 0.0 }
 0x279   :  { %v1570_v20 = vadd.f32 %v1569_v10, %v1568_v27 }
 0x27b   :  { %v1572_v53 = vadd.f32 %v1571_v4, %v1570_v20 }
 0x27d   :  { %v1574_v16 = vadd.f32 %v1573_v14, %v1572_v53 }
 0x27f   :  { %v1576_v11 = vadd.f32 %v1575_v48, %v1574_v16 }
 0x281   :  { %v1578_v19 = vadd.f32 %v1577_v40, %v1576_v11 }
 0x283   :  { %v1579_v32 = vrot.slane %v1578_v19, 4 }
 0x285   :  { %v1580_v3 = vadd.f32 %v1579_v32, %v1578_v19 }
 0x287   :  { %v1581_v21 = vrot.slane %v1580_v3, 2 }
 0x289   :  { %v1582_v45 = vadd.f32 %v1581_v21, %v1580_v3 }
 0x28b   :  { %v1583_v26 = vrot.slane %v1582_v45, 1 }
 0x28d   :  { %v1584_v25 = vadd.f32 %v1583_v26, %v1582_v45 }
 0x28f   :  { %1586 = vst.msk [vmem:[%s3102_s4] sm:$0x1] %vm1585_vm2, %v1584_v25 }
 0x290   :  { %1591 = vsyncpa [#allocation3], 1 }
 0x291   :  { %1592 = vsyncpa [#allocation5], 1 }

</bundles_post_ra>
